<compile_context>
chip_gen: v7x
topology: tpu7x:2x2x1
jax: 0.10.0
libtpu: 0.0.40
codegen_flags: <defaults>
</compile_context>

<pallas_src>
import functools

import jax
import jax.numpy as jnp
from jax.experimental import pallas as pl
from jax.experimental.pallas import tpu as pltpu

LANE = 128
SUBLANE = 8
# Below this contraction size, layer 1 is cheaper as VPU broadcast-MACs than as
# a (mostly padding) MXU pass.
_MXU_K_THRESHOLD = 16


def _round_up(n, m):
    return ((n + m - 1) // m) * m


def mlp_kernel(x_ref, w1_ref, b1_ref, w2_ref, b2_ref, o_ref):
    """One batch tile of: out = tanh(x @ W1 + b1) @ W2 + b2.

    Layer 1: VPU broadcast multiply-adds when K is tiny (default path here),
             MXU matmul otherwise.  Layer 2: MXU matmul over the lane-padded
             hidden dim with f32 accumulation.
    """
    x = x_ref[...].astype(jnp.float32)                        # (TB, in)
    in_features = x_ref.shape[1]                              # static (2)

    # ----- layer 1 -----
    if in_features < _MXU_K_THRESHOLD:
        # Tiny contraction: keep it on the VPU (f32 multiply-adds).
        h = x[:, 0:1] * w1_ref[0:1, :].astype(jnp.float32)    # (TB, Hp)
        for k in range(1, in_features):                       # tiny static loop
            h = h + x[:, k:k + 1] * w1_ref[k:k + 1, :].astype(jnp.float32)
    else:
        h = jnp.dot(x.astype(w1_ref.dtype), w1_ref[...],
                    preferred_element_type=jnp.float32)
    h = h + b1_ref[...].astype(jnp.float32)
    h = jnp.tanh(h)                                           # EUP, f32

    # ----- layer 2: MXU matmul (K = 128 after padding), f32 accumulation -----
    out = jnp.dot(h.astype(w2_ref.dtype), w2_ref[...],
                  preferred_element_type=jnp.float32)
    out = out + b2_ref[...].astype(jnp.float32)
    o_ref[...] = out.astype(o_ref.dtype)                      # unmasked vst (128 lanes)


@functools.partial(jax.jit, static_argnames=("block_batch", "use_bf16_matmul"))
def mlp_forward(x, w1, b1, w2, b2, *, block_batch=256, use_bf16_matmul=True):
    """x: (batch, in); w1: (in, hidden); b1: (1, hidden); w2: (hidden, out); b2: (1, out).

    Weights are stored transposed vs. PyTorch so the kernel computes plain x @ W + b.
    """
    batch, in_features = x.shape
    hidden = w1.shape[1]
    out_features = w2.shape[1]

    # Lane-align hidden and output dims. Zero padding is numerically exact:
    # tanh(0) = 0 and zero rows of W2 / zero lanes of b2 contribute nothing.
    hidden_p = _round_up(hidden, LANE)          # 100 -> 128
    out_p = _round_up(out_features, LANE)       # 2   -> 128

    w1_p = jnp.pad(w1, ((0, 0), (0, hidden_p - hidden)))
    b1_p = jnp.pad(b1, ((0, 0), (0, hidden_p - hidden)))
    w2_p = jnp.pad(w2, ((0, hidden_p - hidden), (0, out_p - out_features)))
    b2_p = jnp.pad(b2, ((0, 0), (0, out_p - out_features)))

    if use_bf16_matmul:
        # bf16 MXU operands; accumulation stays f32 inside the kernel.
        w2_p = w2_p.astype(jnp.bfloat16)

    # Batch grid: x/out tiles stream through double-buffered VMEM while the
    # weights/biases stay resident (same block index every grid step).
    tb = min(block_batch, _round_up(batch, SUBLANE))
    batch_p = _round_up(batch, tb)
    x_p = jnp.pad(x, ((0, batch_p - batch), (0, 0)))

    grid = (batch_p // tb,)
    resident = lambda shape: pl.BlockSpec(shape, lambda i: (0, 0))

    y = pl.pallas_call(
        mlp_kernel,
        out_shape=jax.ShapeDtypeStruct((batch_p, out_p), x.dtype),
        grid=grid,
        in_specs=[
            pl.BlockSpec((tb, in_features), lambda i: (i, 0)),   # streamed x
            resident((in_features, hidden_p)),                   # W1 (resident)
            resident((1, hidden_p)),                             # b1 (resident)
            resident((hidden_p, out_p)),                         # W2 (resident)
            resident((1, out_p)),                                # b2 (resident)
        ],
        out_specs=pl.BlockSpec((tb, out_p), lambda i: (i, 0)),   # lane-dense out
        compiler_params=pltpu.CompilerParams(
            dimension_semantics=("parallel",)),                  # v7x: shard 2 TCs
    )(x_p, w1_p, b1_p, w2_p, b2_p)

    # Free layout plumbing: slice the lane-dense slab back to the logical shape.
    return y[:batch, :out_features]


def init_params(key, input_size=2, hidden=100, output_size=2, dtype=jnp.float32):
    """Deterministic init mimicking nn.Linear's U(-1/sqrt(fan_in), 1/sqrt(fan_in))."""
    k1, k2, k3, k4 = jax.random.split(key, 4)
    bound1 = 1.0 / (input_size ** 0.5)
    bound2 = 1.0 / (hidden ** 0.5)
    # Stored as (in, out) so the kernel does x @ W (PyTorch stores (out, in)).
    w1 = jax.random.uniform(k1, (input_size, hidden), dtype, -bound1, bound1)
    b1 = jax.random.uniform(k2, (1, hidden), dtype, -bound1, bound1)
    w2 = jax.random.uniform(k3, (hidden, output_size), dtype, -bound2, bound2)
    b2 = jax.random.uniform(k4, (1, output_size), dtype, -bound2, bound2)
    return w1, b1, w2, b2


def reference_forward(x, w1, b1, w2, b2):
    h = jnp.tanh(x @ w1 + b1)
    return h @ w2 + b2


if __name__ == "__main__":
    key = jax.random.PRNGKey(0)
    kx, kp, kx_big = jax.random.split(key, 3)

    input_size, hidden, output_size = 2, 100, 2
    w1, b1, w2, b2 = init_params(kp, input_size=input_size,
                                 hidden=hidden, output_size=output_size)

    # Small demo batch.
    batch = 8
    x = jax.random.normal(kx, (batch, input_size), jnp.float32)
    ref = reference_forward(x, w1, b1, w2, b2)

    # Full-f32 path: tight agreement with the reference.
    out_f32 = mlp_forward(x, w1, b1, w2, b2, use_bf16_matmul=False)
    jax.block_until_ready(out_f32)
    assert out_f32.shape == (batch, output_size)
    assert jnp.allclose(out_f32, ref, atol=1e-4, rtol=1e-4)

    # Default bf16-MXU path: looser tolerance from bf16 operand rounding.
    out_bf16 = mlp_forward(x, w1, b1, w2, b2)
    jax.block_until_ready(out_bf16)
    assert out_bf16.shape == (batch, output_size)
    assert jnp.allclose(out_bf16, ref, atol=3e-2, rtol=3e-2)

    # Larger batch exercising the grid (multiple tiles + padded ragged tail).
    x_big = jax.random.normal(kx_big, (300, input_size), jnp.float32)
    out_big = mlp_forward(x_big, w1, b1, w2, b2)
    jax.block_until_ready(out_big)
    assert out_big.shape == (300, output_size)
    assert jnp.allclose(out_big, reference_forward(x_big, w1, b1, w2, b2),
                        atol=3e-2, rtol=3e-2)

    print("KERNEL_OK")
</pallas_src>

<mosaic_0001>
module attributes {stable_mosaic.version = 11 : i64} {
  func.func @mlp_kernel(%arg0: i32, %arg1: memref<8x2xf32, #tpu.memory_space<vmem>>, %arg2: memref<2x128xf32, #tpu.memory_space<vmem>>, %arg3: memref<1x128xf32, #tpu.memory_space<vmem>>, %arg4: memref<128x128xf32, #tpu.memory_space<vmem>>, %arg5: memref<1x128xf32, #tpu.memory_space<vmem>>, %arg6: memref<8x128xf32, #tpu.memory_space<vmem>>) attributes {dimension_semantics = [#tpu.dimension_semantics<parallel>], iteration_bounds = array<i64: 1>, scalar_prefetch = 0 : i64, scratch_operands = 0 : i64, tpu.core_type = #tpu.core_type<tc>, window_params = [{transform_indices = @transform_0, window_bounds = array<i64: 8, 2>}, {pipeline_mode = #tpu.pipeline_mode<synchronous>, transform_indices = @transform_1, window_bounds = array<i64: 2, 128>}, {pipeline_mode = #tpu.pipeline_mode<synchronous>, transform_indices = @transform_2, window_bounds = array<i64: 1, 128>}, {pipeline_mode = #tpu.pipeline_mode<synchronous>, transform_indices = @transform_3, window_bounds = array<i64: 128, 128>}, {pipeline_mode = #tpu.pipeline_mode<synchronous>, transform_indices = @transform_4, window_bounds = array<i64: 1, 128>}, {transform_indices = @transform_5, window_bounds = array<i64: 8, 128>}]} {
    %c0 = arith.constant 0 : index
    %c0_0 = arith.constant 0 : index
    %0 = vector.load %arg1[%c0, %c0_0] : memref<8x2xf32, #tpu.memory_space<vmem>>, vector<8x2xf32>
    %1 = vector.extract_strided_slice %0 {offsets = [0, 0], sizes = [8, 1], strides = [1, 1]} : vector<8x2xf32> to vector<8x1xf32>
    %c0_1 = arith.constant 0 : index
    %c0_2 = arith.constant 0 : index
    %2 = vector.load %arg2[%c0_1, %c0_2] : memref<2x128xf32, #tpu.memory_space<vmem>>, vector<1x128xf32>
    %3 = vector.broadcast %1 : vector<8x1xf32> to vector<8x128xf32>
    %4 = vector.broadcast %2 : vector<1x128xf32> to vector<8x128xf32>
    %5 = arith.mulf %3, %4 : vector<8x128xf32>
    %6 = vector.extract_strided_slice %0 {offsets = [0, 1], sizes = [8, 1], strides = [1, 1]} : vector<8x2xf32> to vector<8x1xf32>
    %c1 = arith.constant 1 : index
    %c0_3 = arith.constant 0 : index
    %7 = vector.load %arg2[%c1, %c0_3] : memref<2x128xf32, #tpu.memory_space<vmem>>, vector<1x128xf32>
    %8 = vector.broadcast %6 : vector<8x1xf32> to vector<8x128xf32>
    %9 = vector.broadcast %7 : vector<1x128xf32> to vector<8x128xf32>
    %10 = arith.mulf %8, %9 : vector<8x128xf32>
    %11 = arith.addf %5, %10 : vector<8x128xf32>
    %c0_4 = arith.constant 0 : index
    %c0_5 = arith.constant 0 : index
    %12 = vector.load %arg3[%c0_4, %c0_5] : memref<1x128xf32, #tpu.memory_space<vmem>>, vector<1x128xf32>
    %13 = vector.broadcast %12 : vector<1x128xf32> to vector<8x128xf32>
    %14 = arith.addf %11, %13 : vector<8x128xf32>
    %15 = math.tanh %14 : vector<8x128xf32>
    %c0_6 = arith.constant 0 : index
    %c0_7 = arith.constant 0 : index
    %16 = vector.load %arg4[%c0_6, %c0_7] : memref<128x128xf32, #tpu.memory_space<vmem>>, vector<128x128xf32>
    %cst = arith.constant dense<0.000000e+00> : vector<8x128xf32>
    %17 = tpu.matmul %15, %16, %cst {dimension_numbers = #tpu.dot_dimension_numbers<[1], [0], [0], [1], [0, 0, 1, 1], [], []>} : vector<8x128xf32>, vector<128x128xf32>, vector<8x128xf32> -> vector<8x128xf32>
    %c0_8 = arith.constant 0 : index
    %c0_9 = arith.constant 0 : index
    %18 = vector.load %arg5[%c0_8, %c0_9] : memref<1x128xf32, #tpu.memory_space<vmem>>, vector<1x128xf32>
    %19 = vector.broadcast %18 : vector<1x128xf32> to vector<8x128xf32>
    %20 = arith.addf %17, %19 : vector<8x128xf32>
    %c0_10 = arith.constant 0 : index
    %c0_11 = arith.constant 0 : index
    %21 = vector.load %arg6[%c0_10, %c0_11] : memref<8x128xf32, #tpu.memory_space<vmem>>, vector<8x128xf32>
    tpu.vector_store %arg6[%c0_10, %c0_11], %20 {strides = array<i32>} : memref<8x128xf32, #tpu.memory_space<vmem>>, vector<8x128xf32>,
    return
  }
  func.func @transform_0(%arg0: i32) -> (i32, i32) {
    %c0_i32 = arith.constant 0 : i32
    %c0_i32_0 = arith.constant 0 : i32
    return %arg0, %c0_i32 : i32, i32
  }
  func.func @transform_1(%arg0: i32) -> (i32, i32) {
    %c0_i32 = arith.constant 0 : i32
    %c0_i32_0 = arith.constant 0 : i32
    %c0_i32_1 = arith.constant 0 : i32
    return %c0_i32, %c0_i32_0 : i32, i32
  }
  func.func @transform_2(%arg0: i32) -> (i32, i32) {
    %c0_i32 = arith.constant 0 : i32
    %c0_i32_0 = arith.constant 0 : i32
    %c0_i32_1 = arith.constant 0 : i32
    return %c0_i32, %c0_i32_0 : i32, i32
  }
  func.func @transform_3(%arg0: i32) -> (i32, i32) {
    %c0_i32 = arith.constant 0 : i32
    %c0_i32_0 = arith.constant 0 : i32
    %c0_i32_1 = arith.constant 0 : i32
    return %c0_i32, %c0_i32_0 : i32, i32
  }
  func.func @transform_4(%arg0: i32) -> (i32, i32) {
    %c0_i32 = arith.constant 0 : i32
    %c0_i32_0 = arith.constant 0 : i32
    %c0_i32_1 = arith.constant 0 : i32
    return %c0_i32, %c0_i32_0 : i32, i32
  }
  func.func @transform_5(%arg0: i32) -> (i32, i32) {
    %c0_i32 = arith.constant 0 : i32
    %c0_i32_0 = arith.constant 0 : i32
    return %arg0, %c0_i32 : i32, i32
  }
}

</mosaic_0001>

<bundles_post_ra>
// kernel: mlp_forward.1
= control target key start
LH: loop header
LB: loop body
LE: loop exit
PB: predicated region body
PF: predicated region fallthrough
CT: control target
= control target key end

     0   :  { %v239_v0 = vmov 0   ;;  %v240_v2 = vmov 0.0|0.0   ;;  %v241_v11 = vmov 1   ;;  %vm242_vm0 = vmmov 0   ;;  %s340_s0 = inlined_call_operand.vmem [shape: f32[8,2], index: 0, kind: input, shape index: {}]   ;;  %s341_s3 = inlined_call_operand.vmem [shape: f32[128,128], index: 3, kind: input, shape index: {}]   ;;  %s342_s1 = inlined_call_operand.vmem [shape: f32[2,128], index: 1, kind: input, shape index: {}]   ;;  %s343_s2 = inlined_call_operand.vmem [shape: f32[1,128], index: 2, kind: input, shape index: {}]   ;;  %s344_s4 = inlined_call_operand.vmem [shape: f32[1,128], index: 4, kind: input, shape index: {}]   ;;  %s345_s5 = inlined_call_operand.vmem [shape: f32[8,128], index: 5, kind: output, shape index: {}]  }
   0x1   :  { %235 = vset.pattern.permute.xlu0 %v239_v0  ;;  %v20_v1 = vld [vmem:[%s340_s0] sm:$0xff]  ;;  %206 = vmatprep.subr.bf16.mxu0 %v240_v2  ;;  %v53_v4 = vld [vmem:[%s341_s3 + $0x8] sm:$0xff]  ;;  %v54_v6 = vld [vmem:[%s341_s3 + $0x10] sm:$0xff]  ;;  %v243_v18 = vmov 0.0  }
   0x2   :  { %v52_v3 = vld [vmem:[%s341_s3] sm:$0xff]  ;;  %24 = vperm.xlu0 %235, %v20_v1   ;;  %v55_v7 = vld [vmem:[%s341_s3 + $0x18] sm:$0xff]  ;;  %v57_v10 = vld [vmem:[%s341_s3 + $0x28] sm:$0xff]  ;;  %203 = vmatprep.mubr.msk.f32.mxu0 %vm242_vm0, %v243_v18 }
   0x3   :  { %v207_v5 = vpack.c.bf16 %v53_v4, %v52_v3  ;;  %v210_v8 = vpack.c.bf16 %v55_v7, %v54_v6  ;;  %v56_v9 = vld [vmem:[%s341_s3 + $0x20] sm:$0xff]  ;;  %v58_v13 = vld [vmem:[%s341_s3 + $0x30] sm:$0xff]  ;;  %v59_v14 = vld [vmem:[%s341_s3 + $0x38] sm:$0xff] }
   0x4   :  { %v213_v12 = vpack.c.bf16 %v57_v10, %v56_v9  ;;  %v216_v15 = vpack.c.bf16 %v59_v14, %v58_v13  ;;  %v60_v16 = vld [vmem:[%s341_s3 + $0x40] sm:$0xff]  ;;  %v61_v17 = vld [vmem:[%s341_s3 + $0x48] sm:$0xff]  ;;  %v62_v20 = vld [vmem:[%s341_s3 + $0x50] sm:$0xff] }
   0x5   :  { %208 = vmatpush3.bf16.msra.mxu0 %v207_v5  ;;  %v219_v19 = vpack.c.bf16 %v61_v17, %v60_v16  ;;  %v63_v21 = vld [vmem:[%s341_s3 + $0x58] sm:$0xff]  ;;  %v64_v23 = vld [vmem:[%s341_s3 + $0x60] sm:$0xff]  ;;  %v65_v24 = vld [vmem:[%s341_s3 + $0x68] sm:$0xff] }
   0x6   :  { %209 = vmatprep.subr.bf16.mxu0 %v240_v2  ;;  %236 = vset.pattern.permute.xlu0 %v241_v11  ;;  %v222_v22 = vpack.c.bf16 %v63_v21, %v62_v20  ;;  %v225_v25 = vpack.c.bf16 %v65_v24, %v64_v23  ;;  %v66_v26 = vld [vmem:[%s341_s3 + $0x70] sm:$0xff]  ;;  %v67_v27 = vld [vmem:[%s341_s3 + $0x78] sm:$0xff]  ;;  %v150_v30 = vld [vmem:[%s342_s1] ss:$0 sm:$0xff] }
   0x7   :  { %34 = vperm.xlu0 %236, %v20_v1   ;;  %v228_v28 = vpack.c.bf16 %v67_v27, %v66_v26  ;;  %v151_v31 = vld [vmem:[%s342_s1 + $0x1] ss:$0 sm:$0xff]  ;;  %v152_v35 = vld [vmem:[%s343_s2] ss:$0 sm:$0xff] }
   0x8   :  { %v153_v39 = vld [vmem:[%s344_s4] ss:$0 sm:$0xff] }
   0x9   :  { %211 = vmatpush3.bf16.msra.mxu0 %v210_v8 }
   0xa   :  { %212 = vmatprep.subr.bf16.mxu0 %v240_v2 }
   0xd   :  { %214 = vmatpush3.bf16.msra.mxu0 %v213_v12 }
   0xe   :  { %215 = vmatprep.subr.bf16.mxu0 %v240_v2 }
  0x11   :  { %217 = vmatpush3.bf16.msra.mxu0 %v216_v15 }
  0x12   :  { %218 = vmatprep.subr.bf16.mxu0 %v240_v2 }
  0x15   :  { %220 = vmatpush3.bf16.msra.mxu0 %v219_v19 }
  0x16   :  { %221 = vmatprep.subr.bf16.mxu0 %v240_v2 }
  0x19   :  { %223 = vmatpush3.bf16.msra.mxu0 %v222_v22 }
  0x1a   :  { %224 = vmatprep.subr.bf16.mxu0 %v240_v2 }
  0x1d   :  { %226 = vmatpush3.bf16.msra.mxu0 %v225_v25 }
  0x1e   :  { %227 = vmatprep.subr.bf16.mxu0 %v240_v2 }
  0x21   :  { %229 = vmatpush3.bf16.msra.mxu0 %v228_v28 }
  0x81   :  { %v25_v29 = vpop.permute.xlu0 %24 }
  0x82   :  { %v31_v33 = vmul.f32 %v150_v30, %v25_v29 }
  0x86   :  { %v35_v32 = vpop.permute.xlu0 %34 }
  0x87   :  { %v41_v34 = vmul.f32 %v151_v31, %v35_v32 }
  0x89   :  { %v42_v36 = vadd.f32 %v41_v34, %v31_v33 }
  0x8b   :  { %v50_v37 = vadd.f32 %v152_v35, %v42_v36 }
  0x8d   :  { %237 = vtanh.f32 %v50_v37 }
  0x97   :  { %v238_v38 = vpop.eup %237 }
  0x98   :  { %204 = vmatmul.mubr.f32.vlgmr.msra.gmra.mrb[0].mxu0 %v238_v38 }
 0x16b   :  { %v141_v40 = vpop.f32.mrb[0].mxu0 }
 0x16c   :  { %v142_v41 = vadd.f32 %v153_v39, %v141_v40  ;;  %v205_v42 = vpop.f32.mrb[1].mxu0 }
 0x16e   :  { %145 = vst [vmem:[%s345_s5] sm:$0xff] %v142_v41 }

</bundles_post_ra>
